<compile_context>
chip_gen: v7x
topology: tpu7x:2x2x1
jax: 0.10.0
libtpu: 0.0.40
codegen_flags: <defaults>
</compile_context>

<pallas_src>
import functools

import jax
import jax.numpy as jnp
from jax.experimental import pallas as pl
from jax.experimental.pallas import tpu as pltpu


def _basic_block_kernel(x_ref, a1_ref, a2_ref, s1_ref, b1_ref, s2_ref, b2_ref,
                        o_ref, pad_ref):
    """Fused conv3x3 -> bn -> relu -> conv3x3 -> bn -> +residual -> relu.

    x_ref   : (B, H, W*C)      width-folded input block (compute dtype)
    a*_ref  : (3, W*C, W*C)    per-kh block-Toeplitz conv weights (compute dtype)
    s*/b*   : (1, W*C)         folded BN scale / bias, tiled over w (f32)
    o_ref   : (B*H, W*C)       output block (input dtype)
    pad_ref : (B, H+2, W*C)    persistent VMEM halo buffer (compute dtype)
    """
    B, Hp2, WC = pad_ref.shape
    H = Hp2 - 2
    M = B * H
    cdt = pad_ref.dtype

    # Re-zero only the two halo rows (the interior is fully overwritten below).
    # Done every grid step -- not just on program_id==0 -- so the kernel stays
    # correct if the "parallel" batch axis is sharded across TensorCores, each
    # with its own scratch instance.
    pad_ref[:, 0:1, :] = jnp.zeros((B, 1, WC), cdt)
    pad_ref[:, H + 1:H + 2, :] = jnp.zeros((B, 1, WC), cdt)

    def conv3x3(a_ref):
        # Zero padding along W is baked into the Toeplitz band of a_ref; the
        # three kh taps are row-shifted reads of the halo buffer.  f32 acc.
        acc = jnp.dot(pad_ref[:, 0:H, :].reshape(M, WC), a_ref[0],
                      preferred_element_type=jnp.float32)
        acc += jnp.dot(pad_ref[:, 1:H + 1, :].reshape(M, WC), a_ref[1],
                       preferred_element_type=jnp.float32)
        acc += jnp.dot(pad_ref[:, 2:H + 2, :].reshape(M, WC), a_ref[2],
                       preferred_element_type=jnp.float32)
        return acc                                              # (M, W*C) f32

    # ---- conv1 -> bn1 -> relu (input goes into the halo interior first)
    pad_ref[:, 1:H + 1, :] = x_ref[...]
    out1 = jnp.maximum(conv3x3(a1_ref) * s1_ref[...] + b1_ref[...], 0.0)

    # ---- conv2 -> bn2 -> +residual -> relu (halo buffer reused for out1)
    pad_ref[:, 1:H + 1, :] = out1.reshape(B, H, WC).astype(cdt)
    out2 = conv3x3(a2_ref) * s2_ref[...] + b2_ref[...]
    residual = x_ref[...].reshape(M, WC).astype(jnp.float32)
    o_ref[...] = jnp.maximum(out2 + residual, 0.0).astype(o_ref.dtype)


def _toeplitz_conv_weights(w, width):
    """(Cout, Cin, 3, 3) PyTorch conv weight -> (3, W*Cin, W*Cout) block-Toeplitz
    matrices (one per kh tap) acting on width-folded (w, c) lane vectors.
    The missing bands at w_out=0 / w_out=W-1 implement the zero padding in W."""
    cout, cin, _, _ = w.shape
    wt = jnp.transpose(w, (2, 3, 1, 0))                 # (kh, kw, Cin, Cout)
    a = jnp.zeros((3, width * cin, width * cout), jnp.float32)
    for kw in range(3):
        for w_out in range(width):
            w_in = w_out + kw - 1
            if 0 <= w_in < width:
                a = a.at[:, w_in * cin:(w_in + 1) * cin,
                         w_out * cout:(w_out + 1) * cout].set(wt[:, kw])
    return a


def basic_block_forward(x_nchw, w1, w2, scale1, bias1, scale2, bias2,
                        *, compute_dtype=jnp.bfloat16, block_batch=None):
    """x_nchw: (N, C, H, W); conv weights are PyTorch-layout (Cout, Cin, 3, 3)."""
    N, C, H, W = x_nchw.shape
    assert w1.shape == (C, C, 3, 3) and w2.shape == (C, C, 3, 3)
    WC = W * C

    if block_batch is None:
        # Aim for >=256 matmul rows (B*H) per grid step when the batch allows.
        target = min(N, max(1, -(-256 // H)))
        block_batch = next(b for b in range(target, N + 1) if N % b == 0)
    B = block_batch
    assert N % B == 0
    grid = (N // B,)

    # NCHW -> NHWC -> fold (w, c) onto the lane axis; cast once for the MXU.
    # TODO(synk): accept NHWC at the API boundary to drop this transpose pair.
    x_folded = jnp.transpose(x_nchw, (0, 2, 3, 1)).reshape(N, H, WC)
    x_folded = x_folded.astype(compute_dtype)

    a1 = _toeplitz_conv_weights(w1, W).astype(compute_dtype)
    a2 = _toeplitz_conv_weights(w2, W).astype(compute_dtype)
    # BN scale / bias tiled over w so they broadcast over the folded lane axis.
    s1 = jnp.tile(scale1.astype(jnp.float32), W).reshape(1, WC)
    b1 = jnp.tile(bias1.astype(jnp.float32), W).reshape(1, WC)
    s2 = jnp.tile(scale2.astype(jnp.float32), W).reshape(1, WC)
    b2 = jnp.tile(bias2.astype(jnp.float32), W).reshape(1, WC)

    out_flat = pl.pallas_call(
        _basic_block_kernel,
        out_shape=jax.ShapeDtypeStruct((N * H, WC), x_nchw.dtype),
        grid_spec=pltpu.PrefetchScalarGridSpec(
            num_scalar_prefetch=0,
            grid=grid,
            in_specs=[
                pl.BlockSpec((B, H, WC), lambda n: (n, 0, 0)),
                pl.BlockSpec((3, WC, WC), lambda n: (0, 0, 0)),
                pl.BlockSpec((3, WC, WC), lambda n: (0, 0, 0)),
                pl.BlockSpec((1, WC), lambda n: (0, 0)),
                pl.BlockSpec((1, WC), lambda n: (0, 0)),
                pl.BlockSpec((1, WC), lambda n: (0, 0)),
                pl.BlockSpec((1, WC), lambda n: (0, 0)),
            ],
            out_specs=pl.BlockSpec((B * H, WC), lambda n: (n, 0)),
            scratch_shapes=[pltpu.VMEM((B, H + 2, WC), compute_dtype)],
        ),
        compiler_params=pltpu.CompilerParams(
            dimension_semantics=("parallel",),
            vmem_limit_bytes=32 * 1024 * 1024,   # safe on v5e/v6e/v7x
        ),
    )(x_folded, a1, a2, s1, b1, s2, b2)

    return jnp.transpose(out_flat.reshape(N, H, W, C), (0, 3, 1, 2))  # -> NCHW


def _reference_forward(x, w1, w2, scale1, bias1, scale2, bias2, cast_dtype=None):
    """Pure-JAX NCHW reference matching the PyTorch eval-mode BasicBlock.

    If `cast_dtype` is given, inputs/weights and the conv1->conv2 intermediate
    are rounded through it (mirrors the kernel's bf16 MXU feed while keeping
    BN / ReLU / residual math in f32)."""
    def q(a):
        if cast_dtype is None:
            return a
        return a.astype(cast_dtype).astype(jnp.float32)

    conv = functools.partial(
        jax.lax.conv_general_dilated,
        window_strides=(1, 1), padding=((1, 1), (1, 1)),
        dimension_numbers=("NCHW", "OIHW", "NCHW"))
    xq = q(x)
    out = conv(xq, q(w1))
    out = out * scale1[None, :, None, None] + bias1[None, :, None, None]
    out = q(jnp.maximum(out, 0.0))
    out = conv(out, q(w2))
    out = out * scale2[None, :, None, None] + bias2[None, :, None, None]
    return jnp.maximum(out + xq, 0.0)


if __name__ == "__main__":
    # Small shapes consistent with the module: inplanes == planes, stride=1.
    N, C, H, W = 2, 4, 16, 16
    eps = 1e-5

    keys = jax.random.split(jax.random.PRNGKey(0), 11)
    x = jax.random.normal(keys[0], (N, C, H, W), jnp.float32)

    # Deterministic synthetic parameters (PyTorch shapes: conv (Cout,Cin,3,3)).
    w1 = 0.2 * jax.random.normal(keys[1], (C, C, 3, 3), jnp.float32)
    w2 = 0.2 * jax.random.normal(keys[2], (C, C, 3, 3), jnp.float32)
    gamma1 = 1.0 + 0.1 * jax.random.normal(keys[3], (C,), jnp.float32)
    beta1 = 0.1 * jax.random.normal(keys[4], (C,), jnp.float32)
    mean1 = 0.05 * jax.random.normal(keys[5], (C,), jnp.float32)
    var1 = jnp.abs(1.0 + 0.1 * jax.random.normal(keys[6], (C,), jnp.float32))
    gamma2 = 1.0 + 0.1 * jax.random.normal(keys[7], (C,), jnp.float32)
    beta2 = 0.1 * jax.random.normal(keys[8], (C,), jnp.float32)
    mean2 = 0.05 * jax.random.normal(keys[9], (C,), jnp.float32)
    var2 = jnp.abs(1.0 + 0.1 * jax.random.normal(keys[10], (C,), jnp.float32))

    # Fold eval-mode BN into per-channel scale / bias.
    scale1 = gamma1 / jnp.sqrt(var1 + eps)
    bias1 = beta1 - mean1 * scale1
    scale2 = gamma2 / jnp.sqrt(var2 + eps)
    bias2 = beta2 - mean2 * scale2

    # 1) exact-math path (f32 end to end) -- tight correctness check.
    out_f32 = jax.block_until_ready(
        basic_block_forward(x, w1, w2, scale1, bias1, scale2, bias2,
                            compute_dtype=jnp.float32))
    ref_f32 = _reference_forward(x, w1, w2, scale1, bias1, scale2, bias2)
    assert out_f32.shape == (N, C, H, W)
    assert jnp.allclose(out_f32, ref_f32, rtol=1e-3, atol=1e-3), \
        float(jnp.max(jnp.abs(out_f32 - ref_f32)))

    # 2) bf16-fed MXU path (default; the v6e/v7x perf recommendation) --
    #    compared against a reference with the same bf16 rounding of
    #    activations / weights / intermediate (f32 accumulation both sides).
    out_bf = jax.block_until_ready(
        basic_block_forward(x, w1, w2, scale1, bias1, scale2, bias2))
    ref_bf = _reference_forward(x, w1, w2, scale1, bias1, scale2, bias2,
                                cast_dtype=jnp.bfloat16)
    assert out_bf.shape == (N, C, H, W)
    assert jnp.allclose(out_bf, ref_bf, rtol=5e-3, atol=5e-3), \
        float(jnp.max(jnp.abs(out_bf - ref_bf)))

    print("KERNEL_OK")
</pallas_src>

<mosaic_0001>
module attributes {stable_mosaic.version = 11 : i64} {
  func.func @_basic_block_kernel(%arg0: i32, %arg1: memref<2x16x64xf32, #tpu.memory_space<vmem>>, %arg2: memref<3x64x64xf32, #tpu.memory_space<vmem>>, %arg3: memref<3x64x64xf32, #tpu.memory_space<vmem>>, %arg4: memref<1x64xf32, #tpu.memory_space<vmem>>, %arg5: memref<1x64xf32, #tpu.memory_space<vmem>>, %arg6: memref<1x64xf32, #tpu.memory_space<vmem>>, %arg7: memref<1x64xf32, #tpu.memory_space<vmem>>, %arg8: memref<32x64xf32, #tpu.memory_space<vmem>>, %arg9: memref<2x18x64xf32, #tpu.memory_space<vmem>>) attributes {dimension_semantics = [#tpu.dimension_semantics<parallel>], iteration_bounds = array<i64: 1>, scalar_prefetch = 0 : i64, scratch_operands = 1 : i64, tpu.core_type = #tpu.core_type<tc>, window_params = [{transform_indices = @transform_0, window_bounds = array<i64: 2, 16, 64>}, {pipeline_mode = #tpu.pipeline_mode<synchronous>, transform_indices = @transform_1, window_bounds = array<i64: 3, 64, 64>}, {pipeline_mode = #tpu.pipeline_mode<synchronous>, transform_indices = @transform_2, window_bounds = array<i64: 3, 64, 64>}, {pipeline_mode = #tpu.pipeline_mode<synchronous>, transform_indices = @transform_3, window_bounds = array<i64: 1, 64>}, {pipeline_mode = #tpu.pipeline_mode<synchronous>, transform_indices = @transform_4, window_bounds = array<i64: 1, 64>}, {pipeline_mode = #tpu.pipeline_mode<synchronous>, transform_indices = @transform_5, window_bounds = array<i64: 1, 64>}, {pipeline_mode = #tpu.pipeline_mode<synchronous>, transform_indices = @transform_6, window_bounds = array<i64: 1, 64>}, {transform_indices = @transform_7, window_bounds = array<i64: 32, 64>}]} {
    %cst = arith.constant 0.000000e+00 : f32
    %0 = vector.broadcast %cst : f32 to vector<2x1x64xf32>
    %c0 = arith.constant 0 : index
    %c0_0 = arith.constant 0 : index
    %c0_1 = arith.constant 0 : index
    %1 = vector.load %arg9[%c0, %c0_0, %c0_1] : memref<2x18x64xf32, #tpu.memory_space<vmem>>, vector<2x1x64xf32>
    tpu.vector_store %arg9[%c0, %c0_0, %c0_1], %0 {strides = array<i32>} : memref<2x18x64xf32, #tpu.memory_space<vmem>>, vector<2x1x64xf32>,
    %cst_2 = arith.constant 0.000000e+00 : f32
    %2 = vector.broadcast %cst_2 : f32 to vector<2x1x64xf32>
    %c0_3 = arith.constant 0 : index
    %c17 = arith.constant 17 : index
    %c0_4 = arith.constant 0 : index
    %3 = vector.load %arg9[%c0_3, %c17, %c0_4] : memref<2x18x64xf32, #tpu.memory_space<vmem>>, vector<2x1x64xf32>
    tpu.vector_store %arg9[%c0_3, %c17, %c0_4], %2 {strides = array<i32>} : memref<2x18x64xf32, #tpu.memory_space<vmem>>, vector<2x1x64xf32>,
    %c0_5 = arith.constant 0 : index
    %c0_6 = arith.constant 0 : index
    %c0_7 = arith.constant 0 : index
    %4 = vector.load %arg1[%c0_5, %c0_6, %c0_7] : memref<2x16x64xf32, #tpu.memory_space<vmem>>, vector<2x16x64xf32>
    %c0_8 = arith.constant 0 : index
    %c1 = arith.constant 1 : index
    %c0_9 = arith.constant 0 : index
    %5 = vector.load %arg9[%c0_8, %c1, %c0_9] : memref<2x18x64xf32, #tpu.memory_space<vmem>>, vector<2x16x64xf32>
    tpu.vector_store %arg9[%c0_8, %c1, %c0_9], %4 {strides = array<i32>} : memref<2x18x64xf32, #tpu.memory_space<vmem>>, vector<2x16x64xf32>,
    %c0_10 = arith.constant 0 : index
    %c0_11 = arith.constant 0 : index
    %c0_12 = arith.constant 0 : index
    %6 = vector.load %arg9[%c0_10, %c0_11, %c0_12] : memref<2x18x64xf32, #tpu.memory_space<vmem>>, vector<2x16x64xf32>
    %7 = vector.shape_cast %6 : vector<2x16x64xf32> to vector<32x64xf32>
    %c0_13 = arith.constant 0 : index
    %c0_14 = arith.constant 0 : index
    %c0_15 = arith.constant 0 : index
    %8 = vector.load %arg2[%c0_13, %c0_14, %c0_15] : memref<3x64x64xf32, #tpu.memory_space<vmem>>, vector<1x64x64xf32>
    %9 = vector.shape_cast %8 : vector<1x64x64xf32> to vector<64x64xf32>
    %cst_16 = arith.constant dense<0.000000e+00> : vector<32x64xf32>
    %10 = tpu.matmul %7, %9, %cst_16 {dimension_numbers = #tpu.dot_dimension_numbers<[1], [0], [0], [1], [0, 0, 1, 1], [], []>} : vector<32x64xf32>, vector<64x64xf32>, vector<32x64xf32> -> vector<32x64xf32>
    %c0_17 = arith.constant 0 : index
    %c1_18 = arith.constant 1 : index
    %c0_19 = arith.constant 0 : index
    %11 = vector.load %arg9[%c0_17, %c1_18, %c0_19] : memref<2x18x64xf32, #tpu.memory_space<vmem>>, vector<2x16x64xf32>
    %12 = vector.shape_cast %11 : vector<2x16x64xf32> to vector<32x64xf32>
    %c1_20 = arith.constant 1 : index
    %c0_21 = arith.constant 0 : index
    %c0_22 = arith.constant 0 : index
    %13 = vector.load %arg2[%c1_20, %c0_21, %c0_22] : memref<3x64x64xf32, #tpu.memory_space<vmem>>, vector<1x64x64xf32>
    %14 = vector.shape_cast %13 : vector<1x64x64xf32> to vector<64x64xf32>
    %cst_23 = arith.constant dense<0.000000e+00> : vector<32x64xf32>
    %15 = tpu.matmul %12, %14, %cst_23 {dimension_numbers = #tpu.dot_dimension_numbers<[1], [0], [0], [1], [0, 0, 1, 1], [], []>} : vector<32x64xf32>, vector<64x64xf32>, vector<32x64xf32> -> vector<32x64xf32>
    %16 = arith.addf %10, %15 : vector<32x64xf32>
    %c0_24 = arith.constant 0 : index
    %c2 = arith.constant 2 : index
    %c0_25 = arith.constant 0 : index
    %17 = vector.load %arg9[%c0_24, %c2, %c0_25] : memref<2x18x64xf32, #tpu.memory_space<vmem>>, vector<2x16x64xf32>
    %18 = vector.shape_cast %17 : vector<2x16x64xf32> to vector<32x64xf32>
    %c2_26 = arith.constant 2 : index
    %c0_27 = arith.constant 0 : index
    %c0_28 = arith.constant 0 : index
    %19 = vector.load %arg2[%c2_26, %c0_27, %c0_28] : memref<3x64x64xf32, #tpu.memory_space<vmem>>, vector<1x64x64xf32>
    %20 = vector.shape_cast %19 : vector<1x64x64xf32> to vector<64x64xf32>
    %cst_29 = arith.constant dense<0.000000e+00> : vector<32x64xf32>
    %21 = tpu.matmul %18, %20, %cst_29 {dimension_numbers = #tpu.dot_dimension_numbers<[1], [0], [0], [1], [0, 0, 1, 1], [], []>} : vector<32x64xf32>, vector<64x64xf32>, vector<32x64xf32> -> vector<32x64xf32>
    %22 = arith.addf %16, %21 : vector<32x64xf32>
    %c0_30 = arith.constant 0 : index
    %c0_31 = arith.constant 0 : index
    %23 = vector.load %arg4[%c0_30, %c0_31] : memref<1x64xf32, #tpu.memory_space<vmem>>, vector<1x64xf32>
    %24 = vector.broadcast %23 : vector<1x64xf32> to vector<32x64xf32>
    %25 = arith.mulf %22, %24 : vector<32x64xf32>
    %c0_32 = arith.constant 0 : index
    %c0_33 = arith.constant 0 : index
    %26 = vector.load %arg5[%c0_32, %c0_33] : memref<1x64xf32, #tpu.memory_space<vmem>>, vector<1x64xf32>
    %27 = vector.broadcast %26 : vector<1x64xf32> to vector<32x64xf32>
    %28 = arith.addf %25, %27 : vector<32x64xf32>
    %cst_34 = arith.constant 0.000000e+00 : f32
    %29 = vector.broadcast %cst_34 : f32 to vector<32x64xf32>
    %30 = arith.maximumf %28, %29 : vector<32x64xf32>
    %31 = vector.shape_cast %30 : vector<32x64xf32> to vector<2x16x64xf32>
    %c0_35 = arith.constant 0 : index
    %c1_36 = arith.constant 1 : index
    %c0_37 = arith.constant 0 : index
    %32 = vector.load %arg9[%c0_35, %c1_36, %c0_37] : memref<2x18x64xf32, #tpu.memory_space<vmem>>, vector<2x16x64xf32>
    tpu.vector_store %arg9[%c0_35, %c1_36, %c0_37], %31 {strides = array<i32>} : memref<2x18x64xf32, #tpu.memory_space<vmem>>, vector<2x16x64xf32>,
    %c0_38 = arith.constant 0 : index
    %c0_39 = arith.constant 0 : index
    %c0_40 = arith.constant 0 : index
    %33 = vector.load %arg9[%c0_38, %c0_39, %c0_40] : memref<2x18x64xf32, #tpu.memory_space<vmem>>, vector<2x16x64xf32>
    %34 = vector.shape_cast %33 : vector<2x16x64xf32> to vector<32x64xf32>
    %c0_41 = arith.constant 0 : index
    %c0_42 = arith.constant 0 : index
    %c0_43 = arith.constant 0 : index
    %35 = vector.load %arg3[%c0_41, %c0_42, %c0_43] : memref<3x64x64xf32, #tpu.memory_space<vmem>>, vector<1x64x64xf32>
    %36 = vector.shape_cast %35 : vector<1x64x64xf32> to vector<64x64xf32>
    %cst_44 = arith.constant dense<0.000000e+00> : vector<32x64xf32>
    %37 = tpu.matmul %34, %36, %cst_44 {dimension_numbers = #tpu.dot_dimension_numbers<[1], [0], [0], [1], [0, 0, 1, 1], [], []>} : vector<32x64xf32>, vector<64x64xf32>, vector<32x64xf32> -> vector<32x64xf32>
    %c0_45 = arith.constant 0 : index
    %c1_46 = arith.constant 1 : index
    %c0_47 = arith.constant 0 : index
    %38 = vector.load %arg9[%c0_45, %c1_46, %c0_47] : memref<2x18x64xf32, #tpu.memory_space<vmem>>, vector<2x16x64xf32>
    %39 = vector.shape_cast %38 : vector<2x16x64xf32> to vector<32x64xf32>
    %c1_48 = arith.constant 1 : index
    %c0_49 = arith.constant 0 : index
    %c0_50 = arith.constant 0 : index
    %40 = vector.load %arg3[%c1_48, %c0_49, %c0_50] : memref<3x64x64xf32, #tpu.memory_space<vmem>>, vector<1x64x64xf32>
    %41 = vector.shape_cast %40 : vector<1x64x64xf32> to vector<64x64xf32>
    %cst_51 = arith.constant dense<0.000000e+00> : vector<32x64xf32>
    %42 = tpu.matmul %39, %41, %cst_51 {dimension_numbers = #tpu.dot_dimension_numbers<[1], [0], [0], [1], [0, 0, 1, 1], [], []>} : vector<32x64xf32>, vector<64x64xf32>, vector<32x64xf32> -> vector<32x64xf32>
    %43 = arith.addf %37, %42 : vector<32x64xf32>
    %c0_52 = arith.constant 0 : index
    %c2_53 = arith.constant 2 : index
    %c0_54 = arith.constant 0 : index
    %44 = vector.load %arg9[%c0_52, %c2_53, %c0_54] : memref<2x18x64xf32, #tpu.memory_space<vmem>>, vector<2x16x64xf32>
    %45 = vector.shape_cast %44 : vector<2x16x64xf32> to vector<32x64xf32>
    %c2_55 = arith.constant 2 : index
    %c0_56 = arith.constant 0 : index
    %c0_57 = arith.constant 0 : index
    %46 = vector.load %arg3[%c2_55, %c0_56, %c0_57] : memref<3x64x64xf32, #tpu.memory_space<vmem>>, vector<1x64x64xf32>
    %47 = vector.shape_cast %46 : vector<1x64x64xf32> to vector<64x64xf32>
    %cst_58 = arith.constant dense<0.000000e+00> : vector<32x64xf32>
    %48 = tpu.matmul %45, %47, %cst_58 {dimension_numbers = #tpu.dot_dimension_numbers<[1], [0], [0], [1], [0, 0, 1, 1], [], []>} : vector<32x64xf32>, vector<64x64xf32>, vector<32x64xf32> -> vector<32x64xf32>
    %49 = arith.addf %43, %48 : vector<32x64xf32>
    %c0_59 = arith.constant 0 : index
    %c0_60 = arith.constant 0 : index
    %50 = vector.load %arg6[%c0_59, %c0_60] : memref<1x64xf32, #tpu.memory_space<vmem>>, vector<1x64xf32>
    %51 = vector.broadcast %50 : vector<1x64xf32> to vector<32x64xf32>
    %52 = arith.mulf %49, %51 : vector<32x64xf32>
    %c0_61 = arith.constant 0 : index
    %c0_62 = arith.constant 0 : index
    %53 = vector.load %arg7[%c0_61, %c0_62] : memref<1x64xf32, #tpu.memory_space<vmem>>, vector<1x64xf32>
    %54 = vector.broadcast %53 : vector<1x64xf32> to vector<32x64xf32>
    %55 = arith.addf %52, %54 : vector<32x64xf32>
    %c0_63 = arith.constant 0 : index
    %c0_64 = arith.constant 0 : index
    %c0_65 = arith.constant 0 : index
    %56 = vector.load %arg1[%c0_63, %c0_64, %c0_65] : memref<2x16x64xf32, #tpu.memory_space<vmem>>, vector<2x16x64xf32>
    %57 = vector.shape_cast %56 : vector<2x16x64xf32> to vector<32x64xf32>
    %58 = arith.addf %55, %57 : vector<32x64xf32>
    %cst_66 = arith.constant 0.000000e+00 : f32
    %59 = vector.broadcast %cst_66 : f32 to vector<32x64xf32>
    %60 = arith.maximumf %58, %59 : vector<32x64xf32>
    %c0_67 = arith.constant 0 : index
    %c0_68 = arith.constant 0 : index
    %61 = vector.load %arg8[%c0_67, %c0_68] : memref<32x64xf32, #tpu.memory_space<vmem>>, vector<32x64xf32>
    tpu.vector_store %arg8[%c0_67, %c0_68], %60 {strides = array<i32>} : memref<32x64xf32, #tpu.memory_space<vmem>>, vector<32x64xf32>,
    return
  }
  func.func @transform_0(%arg0: i32) -> (i32, i32, i32) {
    %c0_i32 = arith.constant 0 : i32
    %c0_i32_0 = arith.constant 0 : i32
    %c0_i32_1 = arith.constant 0 : i32
    return %arg0, %c0_i32, %c0_i32_0 : i32, i32, i32
  }
  func.func @transform_1(%arg0: i32) -> (i32, i32, i32) {
    %c0_i32 = arith.constant 0 : i32
    %c0_i32_0 = arith.constant 0 : i32
    %c0_i32_1 = arith.constant 0 : i32
    %c0_i32_2 = arith.constant 0 : i32
    return %c0_i32, %c0_i32_0, %c0_i32_1 : i32, i32, i32
  }
  func.func @transform_2(%arg0: i32) -> (i32, i32, i32) {
    %c0_i32 = arith.constant 0 : i32
    %c0_i32_0 = arith.constant 0 : i32
    %c0_i32_1 = arith.constant 0 : i32
    %c0_i32_2 = arith.constant 0 : i32
    return %c0_i32, %c0_i32_0, %c0_i32_1 : i32, i32, i32
  }
  func.func @transform_3(%arg0: i32) -> (i32, i32) {
    %c0_i32 = arith.constant 0 : i32
    %c0_i32_0 = arith.constant 0 : i32
    %c0_i32_1 = arith.constant 0 : i32
    return %c0_i32, %c0_i32_0 : i32, i32
  }
  func.func @transform_4(%arg0: i32) -> (i32, i32) {
    %c0_i32 = arith.constant 0 : i32
    %c0_i32_0 = arith.constant 0 : i32
    %c0_i32_1 = arith.constant 0 : i32
    return %c0_i32, %c0_i32_0 : i32, i32
  }
  func.func @transform_5(%arg0: i32) -> (i32, i32) {
    %c0_i32 = arith.constant 0 : i32
    %c0_i32_0 = arith.constant 0 : i32
    %c0_i32_1 = arith.constant 0 : i32
    return %c0_i32, %c0_i32_0 : i32, i32
  }
  func.func @transform_6(%arg0: i32) -> (i32, i32) {
    %c0_i32 = arith.constant 0 : i32
    %c0_i32_0 = arith.constant 0 : i32
    %c0_i32_1 = arith.constant 0 : i32
    return %c0_i32, %c0_i32_0 : i32, i32
  }
  func.func @transform_7(%arg0: i32) -> (i32, i32) {
    %c0_i32 = arith.constant 0 : i32
    %c0_i32_0 = arith.constant 0 : i32
    return %arg0, %c0_i32 : i32, i32
  }
}

</mosaic_0001>

<bundles_post_ra>
// kernel: tpu_custom_call.1
= control target key start
LH: loop header
LB: loop body
LE: loop exit
PB: predicated region body
PF: predicated region fallthrough
CT: control target
= control target key end

     0   :  { %12 = vsyncpa [#allocation4], 0  ;;  %s1457_s0 = inlined_call_operand.hbm [shape: f32[2,16,64], index: 0, kind: input, shape index: {}]   ;;  %s1458_s1 = inlined_call_operand.hbm [shape: f32[3,64,64], index: 1, kind: input, shape index: {}]   ;;  %s1459_s2 = inlined_call_operand.hbm [shape: f32[3,64,64], index: 2, kind: input, shape index: {}]   ;;  %s1460_s3 = inlined_call_operand.vmem [shape: f32[1,64], index: 3, kind: input, shape index: {}]   ;;  %s1461_s4 = inlined_call_operand.vmem [shape: f32[1,64], index: 4, kind: input, shape index: {}]   ;;  %s1462_s5 = inlined_call_operand.vmem [shape: f32[1,64], index: 5, kind: input, shape index: {}]   ;;  %s1463_s6 = inlined_call_operand.vmem [shape: f32[1,64], index: 6, kind: input, shape index: {}]   ;;  %s1464_s7 = inlined_call_operand.hbm [shape: f32[32,64], index: 7, kind: output, shape index: {}]  }
   0x1   :  { %13 = vsyncpa [#allocation7], 0 }
   0x2   :  { %14 = vsyncpa [#allocation5], 0  ;;  %s1279_s24 = smov [#allocation6]   ;;  %s1280_s26 = smov [#allocation3]  }
   0x3   :  { %s32_s25 = sshll.u32 %s1279_s24, 4  ;;  %s20_s27 = sshll.u32 %s1280_s26, 4  ;;  %s33_s25 = int_to_ptr.vmem [resolvable:$true] %s32_s25  ;;  %s1326_s27 = int_to_ptr.vmem [resolvable:$true] %s20_s27 }
   0x4   :  { %s1185_s30 = scalar_lea.hbm %s1458_s1, 3072 }
   0x5   :  { %p1186_p0 = scmp.ne.s32.totalorder %s1458_s1, %s1185_s30  ;;  %p1189_p1 = scmp.lt.u32.totalorder %s1185_s30, %s1458_s1 }
   0x7   :  { %p1191_p2 = pnand %p1189_p1, %p1186_p0 }
   0x9   :  { %1194 = shalt.err (!%p1191_p2)
}
   0xa   :  { %s1195_s12 = scalar_lea.vmem %s33_s25, 3072  ;;  %p1200_p4 = scmp.lt.s32.totalorder %s33_s25, %s33_s25 }
   0xb   :  { %p1196_p3 = scmp.ne.s32.totalorder %s33_s25, %s1195_s12  ;;  %p1201_p5 = scmp.lt.s32.totalorder %s1195_s12, %s1195_s12 }
   0xd   :  { %p1202_p6 = por %p1201_p5, %p1200_p4 }
   0xf   :  { %p1203_p7 = pnand %p1202_p6, %p1196_p3 }
  0x11   :  { %1206 = shalt.err (!%p1203_p7)
}
  0x12   :  { %s1281_s13 = smov 128   ;;  %s1282_s14 = smov 8  }
  0x13   :  { %38 = dma.hbm_to_vmem [thread:$0]  %s1458_s1, 3072, %s33_s25, [#allocation7], %s1281_s13, %s1281_s13, %s1282_s14  }
  0x14   :  { %s1207_s19 = scalar_lea.hbm %s1457_s0, 512 }
  0x15   :  { %p1208_p8 = scmp.ne.s32.totalorder %s1457_s0, %s1207_s19  ;;  %p1211_p9 = scmp.lt.u32.totalorder %s1207_s19, %s1457_s0 }
  0x17   :  { %p1213_p10 = pnand %p1211_p9, %p1208_p8 }
  0x19   :  { %1216 = shalt.err (!%p1213_p10)
}
  0x1a   :  { %s1217_s24 = scalar_lea.vmem %s1326_s27, 512  ;;  %p1222_p12 = scmp.lt.s32.totalorder %s1326_s27, %s1326_s27 }
  0x1b   :  { %p1218_p11 = scmp.ne.s32.totalorder %s1326_s27, %s1217_s24  ;;  %p1223_p13 = scmp.lt.s32.totalorder %s1217_s24, %s1217_s24 }
  0x1d   :  { %p1224_p0 = por %p1223_p13, %p1222_p12 }
  0x1f   :  { %p1225_p1 = pnand %p1224_p0, %p1218_p11 }
  0x21   :  { %1228 = shalt.err (!%p1225_p1)
}
  0x22   :  { %26 = dma.hbm_to_vmem [thread:$0]  %s1457_s0, 512, %s1326_s27, [#allocation4], %s1281_s13, %s1281_s13, %s1282_s14  }
  0x23   :  { %s1283_s26 = smov [#allocation8]   ;;  %s1229_s8 = scalar_lea.hbm %s1459_s2, 3072 }
  0x24   :  { %s44_s28 = sshll.u32 %s1283_s26, 4  ;;  %p1230_p2 = scmp.ne.s32.totalorder %s1459_s2, %s1229_s8  ;;  %s45_s28 = int_to_ptr.vmem [resolvable:$true] %s44_s28 }
  0x25   :  { %p1233_p3 = scmp.lt.u32.totalorder %s1229_s8, %s1459_s2 }
  0x27   :  { %p1235_p4 = pnand %p1233_p3, %p1230_p2 }
  0x29   :  { %1238 = shalt.err (!%p1235_p4)
}
  0x2a   :  { %s1239_s15 = scalar_lea.vmem %s45_s28, 3072  ;;  %p1244_p6 = scmp.lt.s32.totalorder %s45_s28, %s45_s28 }
  0x2b   :  { %p1240_p5 = scmp.ne.s32.totalorder %s45_s28, %s1239_s15  ;;  %p1245_p7 = scmp.lt.s32.totalorder %s1239_s15, %s1239_s15 }
  0x2d   :  { %p1246_p8 = por %p1245_p7, %p1244_p6 }
  0x2f   :  { %p1247_p9 = pnand %p1246_p8, %p1240_p5 }
  0x31   :  { %1250 = shalt.err (!%p1247_p9)
}
  0x32   :  { %50 = dma.hbm_to_vmem [thread:$0]  %s1459_s2, 3072, %s45_s28, [#allocation7], %s1281_s13, %s1281_s13, %s1282_s14  }
  0x33   :  { %1273 = dma.done.wait [#allocation4], 512  }
  0x34   :  { %1274 = vsyncadd [#allocation4], 4294966784 }
  0x35   :  { %1275 = dma.done.wait [#allocation7], 6144  }
  0x36   :  { %1276 = vsyncadd [#allocation7], 4294961152  ;;  %vm68_vm0 = vcmask 516096   ;;  %v1284_v0 = vmov 0.0   ;;  %v99_v1 = vld [vmem:[#allocation6 + $0x40] sm:$0xff]  ;;  %v100_v2 = vld [vmem:[#allocation6 + $0x48] sm:$0xff] }
  0x37   :  { %69 = vst.msk [vmem:[#allocation2] sm:$0x1] %vm68_vm0, %v1284_v0  ;;  %70 = vst.msk [vmem:[#allocation2 + $0x18] sm:$0x1] %vm68_vm0, %v1284_v0  ;;  %v101_v3 = vld [vmem:[#allocation6 + $0x50] sm:$0xff]  ;;  %vm77_vm1 = vcmask 523264   ;;  %v1066_v4 = vpack.c.bf16 %v100_v2, %v99_v1 }
  0x38   :  { %71 = vst.msk [vmem:[#allocation2 + $0x11] sm:$0x1] %vm68_vm0, %v1284_v0  ;;  %72 = vst.msk [vmem:[#allocation2 + $0x29] sm:$0x1] %vm68_vm0, %v1284_v0  ;;  %v102_v5 = vld [vmem:[#allocation6 + $0x58] sm:$0xff]  ;;  %v103_v7 = vld [vmem:[#allocation6 + $0x60] sm:$0xff] }
  0x39   :  { %v1070_v6 = vpack.c.bf16 %v102_v5, %v101_v3  ;;  %v104_v8 = vld [vmem:[#allocation6 + $0x68] sm:$0xff]  ;;  %v1378_v9 = vld [vmem:[#allocation3] sm:$0xff]  ;;  %1067 = vmatprep.subr.bf16.mxu0 %v1066_v4  ;;  %v1386_v12 = vld [vmem:[#allocation3 + $0x10] sm:$0xff] }
  0x3a   :  { %78 = vst.msk [vmem:[#allocation2 + $0x1] sm:$0xff] %vm77_vm1, %v1378_v9  ;;  %v1382_v10 = vld [vmem:[#allocation3 + $0x8] sm:$0xff]  ;;  %1069 = vmatpush3.bf16.msra.mxu0 %v1066_v4  ;;  %v1074_v11 = vpack.c.bf16 %v104_v8, %v103_v7  ;;  %v105_v13 = vld [vmem:[#allocation6 + $0x70] sm:$0xff]  ;;  %v106_v14 = vld [vmem:[#allocation6 + $0x78] sm:$0xff] }
  0x3b   :  { %79 = vst.msk [vmem:[#allocation2 + $0x9] sm:$0xff] %vm77_vm1, %v1382_v10  ;;  %1071 = vmatprep.subr.bf16.mxu0 %v1070_v6  ;;  %80 = vst.msk [vmem:[#allocation2 + $0x19] sm:$0xff] %vm77_vm1, %v1386_v12  ;;  %v1390_v15 = vld [vmem:[#allocation3 + $0x18] sm:$0xff]  ;;  %v1078_v16 = vpack.c.bf16 %v106_v14, %v105_v13  ;;  %v86_v18 = vld [vmem:[#allocation6] sm:$0xff] }
  0x3c   :  { %81 = vst.msk [vmem:[#allocation2 + $0x21] sm:$0xff] %vm77_vm1, %v1390_v15  ;;  %v87_v19 = vld [vmem:[#allocation6 + $0x8] sm:$0xff]  ;;  %v88_v21 = vld [vmem:[#allocation6 + $0x10] sm:$0xff]  ;;  %v89_v22 = vld [vmem:[#allocation6 + $0x18] sm:$0xff] }
  0x3d   :  { %v1082_v20 = vpack.c.bf16 %v87_v19, %v86_v18  ;;  %v1086_v24 = vpack.c.bf16 %v89_v22, %v88_v21  ;;  %v90_v26 = vld [vmem:[#allocation6 + $0x20] sm:$0xff]  ;;  %v91_v27 = vld [vmem:[#allocation6 + $0x28] sm:$0xff]  ;;  %v92_v31 = vld [vmem:[#allocation6 + $0x30] sm:$0xff] }
  0x3e   :  { %1073 = vmatpush3.bf16.msra.mxu0 %v1070_v6  ;;  %v1090_v29 = vpack.c.bf16 %v91_v27, %v90_v26  ;;  %v93_v32 = vld [vmem:[#allocation6 + $0x38] sm:$0xff]  ;;  %v306_v34 = vld [vmem:[#allocation6 + $0x80] sm:$0xff]  ;;  %v307_v35 = vld [vmem:[#allocation6 + $0x88] sm:$0xff] }
  0x3f   :  { %1075 = vmatprep.subr.bf16.mxu0 %v1074_v11  ;;  %v1094_v33 = vpack.c.bf16 %v93_v32, %v92_v31  ;;  %v1098_v36 = vpack.c.bf16 %v307_v35, %v306_v34  ;;  %v308_v37 = vld [vmem:[#allocation6 + $0x90] sm:$0xff]  ;;  %v309_v38 = vld [vmem:[#allocation6 + $0x98] sm:$0xff]  ;;  %v310_v42 = vld [vmem:[#allocation6 + $0xa0] sm:$0xff] }
  0x40   :  { %v1102_v40 = vpack.c.bf16 %v309_v38, %v308_v37  ;;  %v311_v43 = vld [vmem:[#allocation6 + $0xa8] sm:$0xff]  ;;  %v312_v47 = vld [vmem:[#allocation6 + $0xb0] sm:$0xff]  ;;  %v313_v48 = vld [vmem:[#allocation6 + $0xb8] sm:$0xff] }
  0x41   :  { %v94_v17 = vld [vmem:[#allocation2 + $0x1] sm:$0xff]  ;;  %v1106_v45 = vpack.c.bf16 %v311_v43, %v310_v42  ;;  %v1110_v49 = vpack.c.bf16 %v313_v48, %v312_v47  ;;  %v462_v53 = vld [vmem:[#allocation8 + $0x40] sm:$0xff]  ;;  %v463_v54 = vld [vmem:[#allocation8 + $0x48] sm:$0xff] }
  0x42   :  { %950 = vmatprep.mubr.msk.f32.mxu0 %vm77_vm1, %v94_v17  ;;  %1077 = vmatpush3.bf16.msra.mxu0 %v1074_v11  ;;  %v95_v23 = vld [vmem:[#allocation2 + $0x9] sm:$0xff]  ;;  %v96_v25 = vld [vmem:[#allocation2 + $0x19] sm:$0xff]  ;;  %v1114_v55 = vpack.c.bf16 %v463_v54, %v462_v53 }
  0x43   :  { %1079 = vmatprep.subr.bf16.mxu0 %v1078_v16  ;;  %v97_v28 = vld [vmem:[#allocation2 + $0x21] sm:$0xff]  ;;  %v84_v41 = vld [vmem:[#allocation2 + $0x18] sm:$0xff]  ;;  %v302_v50 = vld [vmem:[#allocation2 + $0xa] sm:$0xff] }
  0x44   :  { %v82_v30 = vld [vmem:[#allocation2] sm:$0xff]  ;;  %v83_v39 = vld [vmem:[#allocation2 + $0x8] sm:$0xff]  ;;  %1115 = vmatprep.subr.bf16.mxu1 %v1114_v55  ;;  %v466_v59 = vld [vmem:[#allocation8 + $0x60] sm:$0xff] }
  0x45   :  { %v85_v44 = vld [vmem:[#allocation2 + $0x20] sm:$0xff]  ;;  %1117 = vmatpush3.bf16.msra.mxu1 %v1114_v55  ;;  %v465_v57 = vld [vmem:[#allocation8 + $0x58] sm:$0xff]  ;;  %v467_v60 = vld [vmem:[#allocation8 + $0x68] sm:$0xff] }
  0x46   :  { %1081 = vmatpush3.bf16.msra.mxu0 %v1078_v16  ;;  %v301_v46 = vld [vmem:[#allocation2 + $0x2] sm:$0xff]  ;;  %v303_v51 = vld [vmem:[#allocation2 + $0x1a] sm:$0xff]  ;;  %v1122_v61 = vpack.c.bf16 %v467_v60, %v466_v59  ;;  %v449_v1 = vld [vmem:[#allocation8] sm:$0xff] }
  0x47   :  { %1083 = vmatprep.subr.bf16.mxu0 %v1082_v20  ;;  %v304_v52 = vld [vmem:[#allocation2 + $0x22] sm:$0xff]  ;;  %v450_v2 = vld [vmem:[#allocation8 + $0x8] sm:$0xff]  ;;  %v846_v4 = vld [vmem:[%s1460_s3] ss:$0 sm:$0xff] }
  0x48   :  { %v464_v56 = vld [vmem:[#allocation8 + $0x50] sm:$0xff]  ;;  %v469_v63 = vld [vmem:[#allocation8 + $0x78] sm:$0xff]  ;;  %v1130_v3 = vpack.c.bf16 %v450_v2, %v449_v1  ;;  %v453_v31 = vld [vmem:[#allocation8 + $0x20] sm:$0xff] }
  0x49   :  { %951 = vmatmul.mubr.msk.f32.vlgmr.msra.gmra.mrb[0].mxu0 %vm77_vm1, %v95_v23  ;;  %v1118_v58 = vpack.c.bf16 %v465_v57, %v464_v56  ;;  %v468_v62 = vld [vmem:[#allocation8 + $0x70] sm:$0xff]  ;;  %v452_v27 = vld [vmem:[#allocation8 + $0x18] sm:$0xff]  ;;  %v454_v32 = vld [vmem:[#allocation8 + $0x28] sm:$0xff] }
  0x4a   :  { %1085 = vmatpush3.bf16.msra.mxu0 %v1082_v20  ;;  %953 = vmatprep.mubr.msk.f32.mxu0 %vm77_vm1, %v96_v25  ;;  %v1126_v0 = vpack.c.bf16 %v469_v63, %v468_v62  ;;  %v847_v6 = vld [vmem:[%s1461_s4] ss:$0 sm:$0xff]  ;;  %v1138_v34 = vpack.c.bf16 %v454_v32, %v453_v31  ;;  %v456_v37 = vld [vmem:[#allocation8 + $0x38] sm:$0xff]  ;;  %v673_v47 = vld [vmem:[#allocation8 + $0xa0] sm:$0xff] }
  0x4b   :  { %1087 = vmatprep.subr.bf16.mxu0 %v1086_v24  ;;  %1119 = vmatprep.subr.bf16.mxu1 %v1118_v58  ;;  %v451_v26 = vld [vmem:[#allocation8 + $0x10] sm:$0xff]  ;;  %v674_v48 = vld [vmem:[#allocation8 + $0xa8] sm:$0xff]  ;;  %v676_v53 = vld [vmem:[#allocation8 + $0xb8] sm:$0xff] }
  0x4c   :  { %1121 = vmatpush3.bf16.msra.mxu1 %v1118_v58  ;;  %v671_v43 = vld [vmem:[#allocation8 + $0x90] sm:$0xff] }
  0x4d   :  { %954 = vmatmul.mubr.msk.f32.gmra.mrb[2].mxu0 %vm77_vm1, %v97_v28  ;;  %1123 = vmatprep.subr.bf16.mxu1 %v1122_v61  ;;  %v860_v59 = vld [vmem:[%s1462_s5] ss:$0 sm:$0xff]  ;;  %s1285_s5 = smov [#allocation9]  }
  0x4e   :  { %1089 = vmatpush3.bf16.msra.mxu0 %v1086_v24  ;;  %972 = vmatprep.mubr.msk.f32.mxu0 %vm77_vm1, %v82_v30 }
  0x4f   :  { %1091 = vmatprep.subr.bf16.mxu0 %v1090_v29 }
  0x50   :  { %1125 = vmatpush3.bf16.msra.mxu1 %v1122_v61  ;;  %v861_v61 = vld [vmem:[%s1463_s6] ss:$0 sm:$0xff]  ;;  %s821_s6 = sshll.u32 %s1285_s5, 4  ;;  %s822_s6 = int_to_ptr.vmem [resolvable:$true] %s821_s6 }
  0x51   :  { %1127 = vmatprep.subr.bf16.mxu1 %v1126_v0  ;;  %s1251_s21 = scalar_lea.vmem %s822_s6, 512  ;;  %p1256_p11 = scmp.lt.s32.totalorder %s822_s6, %s822_s6 }
  0x52   :  { %1093 = vmatpush3.bf16.msra.mxu0 %v1090_v29  ;;  %v1134_v29 = vpack.c.bf16 %v452_v27, %v451_v26  ;;  %p1252_p10 = scmp.ne.s32.totalorder %s822_s6, %s1251_s21  ;;  %p1257_p12 = scmp.lt.s32.totalorder %s1251_s21, %s1251_s21 }
  0x53   :  { %1095 = vmatprep.subr.bf16.mxu0 %v1094_v33 }
  0x54   :  { %1129 = vmatpush3.bf16.msra.mxu1 %v1126_v0  ;;  %p1258_p13 = por %p1257_p12, %p1256_p11 }
  0x55   :  { %1131 = vmatprep.subr.bf16.mxu1 %v1130_v3 }
  0x56   :  { %1097 = vmatpush3.bf16.msra.mxu0 %v1094_v33  ;;  %p1259_p0 = pnand %p1258_p13, %p1252_p10 }
  0x57   :  { %1099 = vmatprep.subr.bf16.mxu0 %v1098_v36 }
  0x59   :  { %973 = vmatmul.mubr.msk.f32.vlgmr.msra.gmra.mrb[0].mxu0 %vm77_vm1, %v83_v39 }
  0x5a   :  { %1101 = vmatpush3.bf16.msra.mxu0 %v1098_v36  ;;  %975 = vmatprep.mubr.msk.f32.mxu0 %vm77_vm1, %v84_v41  ;;  %v455_v36 = vld [vmem:[#allocation8 + $0x30] sm:$0xff]  ;;  %v670_v41 = vld [vmem:[#allocation8 + $0x88] sm:$0xff] }
  0x5b   :  { %1103 = vmatprep.subr.bf16.mxu0 %v1102_v40  ;;  %v1142_v39 = vpack.c.bf16 %v456_v37, %v455_v36 }
  0x5d   :  { %976 = vmatmul.mubr.msk.f32.gmra.mrb[2].mxu0 %vm77_vm1, %v85_v44  ;;  %v672_v44 = vld [vmem:[#allocation8 + $0x98] sm:$0xff] }
  0x5e   :  { %1105 = vmatpush3.bf16.msra.mxu0 %v1102_v40  ;;  %994 = vmatprep.mubr.msk.f32.mxu0 %vm77_vm1, %v301_v46  ;;  %v669_v40 = vld [vmem:[#allocation8 + $0x80] sm:$0xff] }
  0x5f   :  { %1107 = vmatprep.subr.bf16.mxu0 %v1106_v45  ;;  %v1146_v42 = vpack.c.bf16 %v670_v41, %v669_v40 }
  0x62   :  { %1109 = vmatpush3.bf16.msra.mxu0 %v1106_v45  ;;  %v1150_v45 = vpack.c.bf16 %v672_v44, %v671_v43 }
  0x63   :  { %1111 = vmatprep.subr.bf16.mxu0 %v1110_v49 }
  0x66   :  { %1113 = vmatpush3.bf16.msra.mxu0 %v1110_v49 }
  0x69   :  { %995 = vmatmul.mubr.msk.f32.vlgmr.msra.gmra.mrb[0].mxu0 %vm77_vm1, %v302_v50  ;;  %v1154_v50 = vpack.c.bf16 %v674_v48, %v673_v47 }
  0x6a   :  { %997 = vmatprep.mubr.msk.f32.mxu0 %vm77_vm1, %v303_v51 }
  0x6d   :  { %998 = vmatmul.mubr.msk.f32.gmra.mrb[2].mxu0 %vm77_vm1, %v304_v52  ;;  %v675_v52 = vld [vmem:[#allocation8 + $0xb0] sm:$0xff] }
  0x6e   :  { %v1158_v55 = vpack.c.bf16 %v676_v53, %v675_v52 }
 0x13c   :  { %v996_v5 = vpop.f32.mrb[0].mxu0 }
 0x13d   :  { %v423_v7 = vmul.f32 %v996_v5, %v846_v4  ;;  %v392_v8 = vpop.f32.mrb[1].mxu0 }
 0x13e   :  { %v422_v11 = vmul.f32 %v846_v4, %v392_v8 }
 0x13f   :  { %v434_v13 = vadd.f32 %v847_v6, %v423_v7 }
 0x140   :  { %v433_v14 = vadd.f32 %v847_v6, %v422_v11  ;;  %v999_v16 = vpop.f32.mrb[2].mxu0 }
 0x141   :  { %v438_v17 = vmax.f32 %v434_v13, 0.0  ;;  %v425_v18 = vmul.f32 %v999_v16, %v846_v4  ;;  %v402_v19 = vpop.f32.mrb[3].mxu0 }
 0x142   :  { %v437_v20 = vmax.f32 %v433_v14, 0.0  ;;  %v424_v21 = vmul.f32 %v846_v4, %v402_v19 }
 0x143   :  { %442 = vst.msk [vmem:[#allocation2 + $0x9] sm:$0xff] %vm77_vm1, %v438_v17  ;;  %v436_v22 = vadd.f32 %v847_v6, %v425_v18 }
 0x144   :  { %441 = vst.msk [vmem:[#allocation2 + $0x1] sm:$0xff] %vm77_vm1, %v437_v20  ;;  %v435_v23 = vadd.f32 %v847_v6, %v424_v21 }
 0x145   :  { %v440_v24 = vmax.f32 %v436_v22, 0.0 }
 0x146   :  { %v439_v25 = vmax.f32 %v435_v23, 0.0 }
 0x147   :  { %444 = vst.msk [vmem:[#allocation2 + $0x21] sm:$0xff] %vm77_vm1, %v440_v24 }
 0x148   :  { %443 = vst.msk [vmem:[#allocation2 + $0x19] sm:$0xff] %vm77_vm1, %v439_v25 }
 0x14a   :  { %v458_v30 = vld [vmem:[#allocation2 + $0x9] sm:$0xff] }
 0x14b   :  { %v457_v28 = vld [vmem:[#allocation2 + $0x1] sm:$0xff]  ;;  %v665_v56 = vld [vmem:[#allocation2 + $0xa] sm:$0xff] }
 0x14c   :  { %1016 = vmatprep.mubr.msk.f32.mxu1 %vm77_vm1, %v457_v28  ;;  %v445_v38 = vld [vmem:[#allocation2] sm:$0xff]  ;;  %v446_v46 = vld [vmem:[#allocation2 + $0x8] sm:$0xff] }
 0x14d   :  { %1017 = vmatmul.mubr.msk.f32.vlgmr.msra.gmra.mrb[0].mxu1 %vm77_vm1, %v458_v30  ;;  %v664_v54 = vld [vmem:[#allocation2 + $0x2] sm:$0xff] }
 0x14e   :  { %1133 = vmatpush3.bf16.msra.mxu1 %v1130_v3  ;;  %v460_v35 = vld [vmem:[#allocation2 + $0x21] sm:$0xff] }
 0x14f   :  { %v459_v33 = vld [vmem:[#allocation2 + $0x19] sm:$0xff]  ;;  %1135 = vmatprep.subr.bf16.mxu1 %v1134_v29  ;;  %v667_v58 = vld [vmem:[#allocation2 + $0x22] sm:$0xff] }
 0x150   :  { %1019 = vmatprep.mubr.msk.f32.mxu1 %vm77_vm1, %v459_v33  ;;  %v447_v49 = vld [vmem:[#allocation2 + $0x18] sm:$0xff]  ;;  %v448_v51 = vld [vmem:[#allocation2 + $0x20] sm:$0xff] }
 0x151   :  { %1020 = vmatmul.mubr.msk.f32.gmra.mrb[2].mxu1 %vm77_vm1, %v460_v35  ;;  %v666_v57 = vld [vmem:[#allocation2 + $0x1a] sm:$0xff] }
 0x152   :  { %1137 = vmatpush3.bf16.msra.mxu1 %v1134_v29  ;;  %1038 = vmatprep.mubr.msk.f32.mxu1 %vm77_vm1, %v445_v38 }
 0x153   :  { %1139 = vmatprep.subr.bf16.mxu1 %v1138_v34 }
 0x156   :  { %1141 = vmatpush3.bf16.msra.mxu1 %v1138_v34 }
 0x157   :  { %1143 = vmatprep.subr.bf16.mxu1 %v1142_v39 }
 0x15a   :  { %1145 = vmatpush3.bf16.msra.mxu1 %v1142_v39 }
 0x15b   :  { %1147 = vmatprep.subr.bf16.mxu1 %v1146_v42 }
 0x15d   :  { %1039 = vmatmul.mubr.msk.f32.vlgmr.msra.gmra.mrb[0].mxu1 %vm77_vm1, %v446_v46 }
 0x15e   :  { %1041 = vmatprep.mubr.msk.f32.mxu1 %vm77_vm1, %v447_v49  ;;  %1149 = vmatpush3.bf16.msra.mxu1 %v1146_v42 }
 0x15f   :  { %1151 = vmatprep.subr.bf16.mxu1 %v1150_v45 }
 0x161   :  { %1042 = vmatmul.mubr.msk.f32.gmra.mrb[2].mxu1 %vm77_vm1, %v448_v51 }
 0x162   :  { %1153 = vmatpush3.bf16.msra.mxu1 %v1150_v45  ;;  %1060 = vmatprep.mubr.msk.f32.mxu1 %vm77_vm1, %v664_v54 }
 0x163   :  { %1155 = vmatprep.subr.bf16.mxu1 %v1154_v50 }
 0x166   :  { %1157 = vmatpush3.bf16.msra.mxu1 %v1154_v50 }
 0x167   :  { %1159 = vmatprep.subr.bf16.mxu1 %v1158_v55 }
 0x16a   :  { %1161 = vmatpush3.bf16.msra.mxu1 %v1158_v55 }
 0x16d   :  { %1061 = vmatmul.mubr.msk.f32.vlgmr.msra.gmra.mrb[0].mxu1 %vm77_vm1, %v665_v56 }
 0x16e   :  { %1063 = vmatprep.mubr.msk.f32.mxu1 %vm77_vm1, %v666_v57 }
 0x171   :  { %1064 = vmatmul.mubr.msk.f32.gmra.mrb[2].mxu1 %vm77_vm1, %v667_v58 }
 0x240   :  { %v1062_v60 = vpop.f32.mrb[0].mxu1 }
 0x241   :  { %v786_v62 = vmul.f32 %v1062_v60, %v860_v59  ;;  %v755_v63 = vpop.f32.mrb[1].mxu1 }
 0x242   :  { %v785_v0 = vmul.f32 %v860_v59, %v755_v63 }
 0x243   :  { %v797_v1 = vadd.f32 %v861_v61, %v786_v62 }
 0x244   :  { %v796_v2 = vadd.f32 %v861_v61, %v785_v0  ;;  %v1065_v3 = vpop.f32.mrb[2].mxu1 }
 0x245   :  { %v805_v4 = vadd.f32 %v797_v1, %v1382_v10  ;;  %v788_v5 = vmul.f32 %v1065_v3, %v860_v59  ;;  %v765_v6 = vpop.f32.mrb[3].mxu1 }
 0x246   :  { %v804_v7 = vadd.f32 %v796_v2, %v1378_v9  ;;  %v787_v8 = vmul.f32 %v860_v59, %v765_v6 }
 0x247   :  { %v809_v11 = vmax.f32 %v805_v4, 0.0  ;;  %v799_v13 = vadd.f32 %v861_v61, %v788_v5 }
 0x248   :  { %v808_v14 = vmax.f32 %v804_v7, 0.0  ;;  %v798_v16 = vadd.f32 %v861_v61, %v787_v8 }
 0x249   :  { %813 = vst.msk [vmem:[#allocation9 + $0x8] sm:$0xff] %vm77_vm1, %v809_v11  ;;  %v807_v17 = vadd.f32 %v799_v13, %v1390_v15 }
 0x24a   :  { %812 = vst.msk [vmem:[#allocation9] sm:$0xff] %vm77_vm1, %v808_v14  ;;  %v806_v18 = vadd.f32 %v798_v16, %v1386_v12 }
 0x24b   :  { %v811_v10 = vmax.f32 %v807_v17, 0.0 }
 0x24c   :  { %v810_v19 = vmax.f32 %v806_v18, 0.0 }
 0x24d   :  { %815 = vst.msk [vmem:[#allocation9 + $0x18] sm:$0xff] %vm77_vm1, %v811_v10 }
 0x24e   :  { %814 = vst.msk [vmem:[#allocation9 + $0x10] sm:$0xff] %vm77_vm1, %v810_v19 }
 0x24f   :  { %1262 = shalt.err (!%p1259_p0)
}
 0x250   :  { %s1263_s24 = scalar_lea.hbm %s1464_s7, 512 }
 0x251   :  { %p1264_p1 = scmp.ne.s32.totalorder %s1464_s7, %s1263_s24  ;;  %p1267_p2 = scmp.lt.u32.totalorder %s1263_s24, %s1464_s7 }
 0x253   :  { %p1269_p3 = pnand %p1267_p2, %p1264_p1 }
 0x255   :  { %1272 = shalt.err (!%p1269_p3)
}
 0x256   :  { %827 = dma.vmem_to_hbm [thread:$0]  %s822_s6, 512, %s1464_s7, [#allocation5], %s1281_s13, %s1281_s13, %s1282_s14  }
 0x257   :  { %1277 = dma.done.wait [#allocation5], 512  }
 0x258   :  { %1278 = vsyncadd [#allocation5], 4294966784 }
 0x259   :  { %831 = vsyncpa [#allocation4], 1 }
 0x25a   :  { %832 = vsyncpa [#allocation7], 1 }
 0x25b   :  { %833 = vsyncpa [#allocation5], 1 }

</bundles_post_ra>
